<compile_context>
chip_gen: v7x
topology: tpu7x:2x2x1
jax: 0.10.0
libtpu: 0.0.40
codegen_flags: <defaults>
</compile_context>

<pallas_src>
import jax
import jax.numpy as jnp
from jax import lax
from jax.experimental import pallas as pl
from jax.experimental.pallas import tpu as pltpu


def _specaug_kernel(ts_ref, te_ref, fs_ref, fe_ref, x_ref, o_ref):
    """Masked zero-fill for one (B_BLK, F, T_BLK) tile.

    ts/te/fs/fe: int32 (B_BLK, 1, 1) effective mask start/end along time /
                 frequency (already folded with the Bernoulli decisions:
                 empty range when the corresponding mask is disabled).
    x_ref/o_ref: (B_BLK, F, T_BLK) VMEM tiles.
    """
    x = x_ref[...]                                   # (B_BLK, F, T_BLK)
    _, F, TB = x.shape

    # Global time offset of this tile (lane axis is tiled across the grid).
    t0 = pl.program_id(1) * TB

    # Narrow compares: (1, 1, TB) along lanes, (1, F, 1) along sublanes; the
    # per-row bounds broadcast along the batch (leading) axis.
    t_idx = lax.broadcasted_iota(jnp.int32, (1, 1, TB), 2) + t0
    f_idx = lax.broadcasted_iota(jnp.int32, (1, F, 1), 1)

    t_in = (t_idx >= ts_ref[...]) & (t_idx < te_ref[...])   # (B_BLK, 1, TB)
    f_in = (f_idx >= fs_ref[...]) & (f_idx < fe_ref[...])   # (B_BLK, F, 1)

    # Fill value is 0, so the original blend folds to a single select.
    o_ref[...] = jnp.where(t_in | f_in, jnp.zeros((), x.dtype), x)


def specaug_pallas(x, t_start, t_end, f_start, f_end, dec_t, dec_f,
                   *, t_blk=None, b_blk=None, donate_x=False):
    """x: (B, F, T) float; scalar args: int (B,).

    t_blk (if given) must be a multiple of 128 or equal to T.
    b_blk (if given) should divide B.
    donate_x=True aliases x into the output (in-place augmentation).
    """
    B, F, T = x.shape
    itemsize = jnp.dtype(x.dtype).itemsize

    # Fold the Bernoulli decisions into the bounds on the XLA side:
    # disabled mask -> empty [0, 0) range.  Keeps the kernel vector path
    # free of any decision logic.
    on_t = dec_t.astype(jnp.int32) != 0
    on_f = dec_f.astype(jnp.int32) != 0
    ts = jnp.where(on_t, t_start.astype(jnp.int32), 0).reshape(B, 1, 1)
    te = jnp.where(on_t, t_end.astype(jnp.int32), 0).reshape(B, 1, 1)
    fs = jnp.where(on_f, f_start.astype(jnp.int32), 0).reshape(B, 1, 1)
    fe = jnp.where(on_f, f_end.astype(jnp.int32), 0).reshape(B, 1, 1)

    # --- Block sizing ------------------------------------------------------
    # ~2 MiB per block => double-buffered in + out ~= 8 MiB, comfortably under
    # the scoped-VMEM limit on every generation (v5e 16 MiB default / 128 MiB
    # physical, v7x 64 MiB physical) while big enough to amortize the
    # ~0.35us per-grid-step overhead.
    budget = 2 * 1024 * 1024
    row_bytes = max(F * itemsize, 1)
    if t_blk is None:
        if T <= 128 or T * row_bytes <= budget:
            t_blk = T                                  # full extent: always legal
        else:
            t_blk = max(128, (budget // row_bytes) // 128 * 128)
    if b_blk is None:
        blk_bytes = max(F * t_blk * itemsize, 1)
        target = int(max(1, min(B, budget // blk_bytes)))
        # Largest divisor of B that fits the budget (keeps batch tiles exact).
        b_blk = max(d for d in range(1, target + 1) if B % d == 0)

    # Ensure >= 2 grid steps whenever the problem allows it, so that the
    # ('parallel', 'parallel') grid actually feeds both TensorCores on v7x.
    if pl.cdiv(B, b_blk) * pl.cdiv(T, t_blk) < 2:
        if B >= 2:
            b_blk = max(d for d in range(1, B // 2 + 1) if B % d == 0)
        elif T > 128:
            t_blk = 128 * ((pl.cdiv(T, 128) + 1) // 2)

    grid = (pl.cdiv(B, b_blk), pl.cdiv(T, t_blk))

    bounds_spec = pl.BlockSpec((b_blk, 1, 1), lambda b, t: (b, 0, 0))
    x_spec = pl.BlockSpec((b_blk, F, t_blk), lambda b, t: (b, 0, t))

    return pl.pallas_call(
        _specaug_kernel,
        out_shape=jax.ShapeDtypeStruct((B, F, T), x.dtype),
        grid_spec=pltpu.PrefetchScalarGridSpec(
            num_scalar_prefetch=0,
            grid=grid,
            in_specs=[bounds_spec, bounds_spec, bounds_spec, bounds_spec,
                      x_spec],
            out_specs=x_spec,
        ),
        compiler_params=pltpu.CompilerParams(
            # Both axes independent -> shard across v7x's 2 TensorCores.
            dimension_semantics=("parallel", "parallel"),
            # Explicit headroom: safe on v7x (64 MiB physical) and raises
            # v5e's 16 MiB default so large-F shapes keep DMA-efficient tiles.
            vmem_limit_bytes=48 * 1024 * 1024,
        ),
        # x is input index 4 (after the four bounds arrays).
        input_output_aliases={4: 0} if donate_x else {},
    )(ts, te, fs, fe, x)


class SpecAugJax:
    """JAX/Pallas port of SpecAug (spectrogram input path, iid per-sample masks)."""

    def __init__(self, time_width=80, time_prob=0.5,
                 freq_width=80, freq_prob=0.5, iid=True):
        assert 0.0 <= time_prob <= 1.0 and 0.0 <= freq_prob <= 1.0
        self.time_width = time_width
        self.time_prob = time_prob
        self.freq_width = freq_width
        self.freq_prob = freq_prob
        self.iid = iid  # masks are always per-sample here (iid path)

    def _sample_axis_mask(self, key, batch, axis_size, mask_param):
        # torchaudio mask_along_axis_iid semantics:
        #   value ~ U(0, mask_param); min ~ U(0, size - value)
        #   mask range = [floor(min), floor(min + value))
        k_val, k_min = jax.random.split(key)
        value = jax.random.uniform(k_val, (batch,)) * mask_param
        value = jnp.minimum(value, float(axis_size))   # clamp if param > axis
        min_v = jax.random.uniform(k_min, (batch,)) * (axis_size - value)
        start = jnp.floor(min_v).astype(jnp.int32)
        end = jnp.floor(min_v + value).astype(jnp.int32)
        return start, end

    def process(self, key, x):
        """x: (B, F, T) spectrogram (magnitude or features)."""
        B, F, T = x.shape
        k_t, k_td, k_f, k_fd = jax.random.split(key, 4)
        t_start, t_end = self._sample_axis_mask(k_t, B, T, self.time_width)
        f_start, f_end = self._sample_axis_mask(k_f, B, F, self.freq_width)
        dec_t = jax.random.bernoulli(k_td, self.time_prob, (B,)).astype(jnp.int32)
        dec_f = jax.random.bernoulli(k_fd, self.freq_prob, (B,)).astype(jnp.int32)
        return specaug_pallas(x, t_start, t_end, f_start, f_end, dec_t, dec_f)


def _reference(x, ts, te, fs, fe, dt, df):
    """Pure-JAX reference of the original blended masking.

    NOTE: uses a multiply-blend, which differs from masked_fill only for
    NaN/Inf inputs (the kernel writes exact zeros, matching torchaudio).
    Test data below is finite, so the comparison is exact.
    """
    B, F, T = x.shape
    t_idx = jnp.arange(T)[None, None, :]
    f_idx = jnp.arange(F)[None, :, None]
    tm = ((t_idx >= ts[:, None, None]) & (t_idx < te[:, None, None])).astype(x.dtype)
    fm = ((f_idx >= fs[:, None, None]) & (f_idx < fe[:, None, None])).astype(x.dtype)
    dt = dt.astype(x.dtype)[:, None, None]
    df = df.astype(x.dtype)[:, None, None]
    x1 = dt * (x * (1.0 - tm)) + (1.0 - dt) * x
    x2 = df * (x1 * (1.0 - fm)) + (1.0 - df) * x1
    return x2


if __name__ == "__main__":
    key = jax.random.PRNGKey(0)
    k_data, k_aug = jax.random.split(key)

    aug = SpecAugJax(time_width=20, time_prob=0.5,
                     freq_width=10, freq_prob=0.5, iid=True)

    # --- Test 1: small aligned (B, F, T) spectrogram -------------------------
    B, F, T = 2, 64, 128
    x = jax.random.uniform(k_data, (B, F, T), dtype=jnp.float32)

    k_t, k_td, k_f, k_fd = jax.random.split(k_aug, 4)
    t_start, t_end = aug._sample_axis_mask(k_t, B, T, aug.time_width)
    f_start, f_end = aug._sample_axis_mask(k_f, B, F, aug.freq_width)
    dec_t = jax.random.bernoulli(k_td, aug.time_prob, (B,)).astype(jnp.int32)
    dec_f = jax.random.bernoulli(k_fd, aug.freq_prob, (B,)).astype(jnp.int32)

    out = specaug_pallas(x, t_start, t_end, f_start, f_end, dec_t, dec_f)
    out = jax.block_until_ready(out)
    ref = _reference(x, t_start, t_end, f_start, f_end, dec_t, dec_f)
    assert out.shape == x.shape and out.dtype == x.dtype
    assert jnp.allclose(out, ref, atol=1e-6, rtol=1e-6)

    # --- Test 2: non-aligned shape (F=65, T=300), auto block sizing ----------
    B2, F2, T2 = 3, 65, 300
    x2 = jax.random.uniform(jax.random.PRNGKey(3), (B2, F2, T2), jnp.float32)
    k2_t, k2_td, k2_f, k2_fd = jax.random.split(jax.random.PRNGKey(7), 4)
    ts2, te2 = aug._sample_axis_mask(k2_t, B2, T2, aug.time_width)
    fs2, fe2 = aug._sample_axis_mask(k2_f, B2, F2, aug.freq_width)
    dt2 = jax.random.bernoulli(k2_td, aug.time_prob, (B2,)).astype(jnp.int32)
    df2 = jax.random.bernoulli(k2_fd, aug.freq_prob, (B2,)).astype(jnp.int32)
    out2 = jax.block_until_ready(
        specaug_pallas(x2, ts2, te2, fs2, fe2, dt2, df2))
    ref2 = _reference(x2, ts2, te2, fs2, fe2, dt2, df2)
    assert out2.shape == x2.shape
    assert jnp.allclose(out2, ref2, atol=1e-6, rtol=1e-6)

    # --- Test 3: same shape, forced 128-wide time tiles (ragged last tile) ---
    out3 = jax.block_until_ready(
        specaug_pallas(x2, ts2, te2, fs2, fe2, dt2, df2, t_blk=128, b_blk=1))
    assert jnp.allclose(out3, ref2, atol=1e-6, rtol=1e-6)

    # --- Test 4: high-level API (fresh randomness, shape/dtype sanity) -------
    out4 = jax.block_until_ready(aug.process(jax.random.PRNGKey(11), x))
    assert out4.shape == x.shape and out4.dtype == x.dtype

    print("KERNEL_OK")
</pallas_src>

<mosaic_0001>
module attributes {stable_mosaic.version = 11 : i64} {
  func.func @_specaug_kernel(%arg0: i32, %arg1: i32, %arg2: memref<1x1x1xi32, #tpu.memory_space<vmem>>, %arg3: memref<1x1x1xi32, #tpu.memory_space<vmem>>, %arg4: memref<1x1x1xi32, #tpu.memory_space<vmem>>, %arg5: memref<1x1x1xi32, #tpu.memory_space<vmem>>, %arg6: memref<1x64x128xf32, #tpu.memory_space<vmem>>, %arg7: memref<1x64x128xf32, #tpu.memory_space<vmem>>) attributes {dimension_semantics = [#tpu.dimension_semantics<parallel>, #tpu.dimension_semantics<parallel>], iteration_bounds = array<i64: 2, 1>, scalar_prefetch = 0 : i64, scratch_operands = 0 : i64, tpu.core_type = #tpu.core_type<tc>, window_params = [{transform_indices = @transform_0, window_bounds = array<i64: 1, 1, 1>}, {transform_indices = @transform_1, window_bounds = array<i64: 1, 1, 1>}, {transform_indices = @transform_2, window_bounds = array<i64: 1, 1, 1>}, {transform_indices = @transform_3, window_bounds = array<i64: 1, 1, 1>}, {transform_indices = @transform_4, window_bounds = array<i64: 1, 64, 128>}, {transform_indices = @transform_5, window_bounds = array<i64: 1, 64, 128>}]} {
    %c0 = arith.constant 0 : index
    %c0_0 = arith.constant 0 : index
    %c0_1 = arith.constant 0 : index
    %0 = vector.load %arg6[%c0, %c0_0, %c0_1] : memref<1x64x128xf32, #tpu.memory_space<vmem>>, vector<1x64x128xf32>
    %c128_i32 = arith.constant 128 : i32
    %1 = arith.muli %arg1, %c128_i32 : i32
    %2 = tpu.iota {dimensions = array<i32: 2>} : vector<1x1x128xi32>
    %3 = vector.broadcast %1 : i32 to vector<1x1x128xi32>
    %4 = arith.addi %2, %3 : vector<1x1x128xi32>
    %5 = tpu.iota {dimensions = array<i32: 1>} : vector<1x64x1xi32>
    %c0_2 = arith.constant 0 : index
    %c0_3 = arith.constant 0 : index
    %c0_4 = arith.constant 0 : index
    %6 = vector.load %arg2[%c0_2, %c0_3, %c0_4] : memref<1x1x1xi32, #tpu.memory_space<vmem>>, vector<1x1x1xi32>
    %7 = vector.broadcast %6 : vector<1x1x1xi32> to vector<1x1x128xi32>
    %8 = arith.cmpi sge, %4, %7 : vector<1x1x128xi32>
    %c0_5 = arith.constant 0 : index
    %c0_6 = arith.constant 0 : index
    %c0_7 = arith.constant 0 : index
    %9 = vector.load %arg3[%c0_5, %c0_6, %c0_7] : memref<1x1x1xi32, #tpu.memory_space<vmem>>, vector<1x1x1xi32>
    %10 = vector.broadcast %9 : vector<1x1x1xi32> to vector<1x1x128xi32>
    %11 = arith.cmpi slt, %4, %10 : vector<1x1x128xi32>
    %12 = arith.andi %8, %11 : vector<1x1x128xi1>
    %c0_8 = arith.constant 0 : index
    %c0_9 = arith.constant 0 : index
    %c0_10 = arith.constant 0 : index
    %13 = vector.load %arg4[%c0_8, %c0_9, %c0_10] : memref<1x1x1xi32, #tpu.memory_space<vmem>>, vector<1x1x1xi32>
    %14 = vector.broadcast %13 : vector<1x1x1xi32> to vector<1x64x1xi32>
    %15 = arith.cmpi sge, %5, %14 : vector<1x64x1xi32>
    %c0_11 = arith.constant 0 : index
    %c0_12 = arith.constant 0 : index
    %c0_13 = arith.constant 0 : index
    %16 = vector.load %arg5[%c0_11, %c0_12, %c0_13] : memref<1x1x1xi32, #tpu.memory_space<vmem>>, vector<1x1x1xi32>
    %17 = vector.broadcast %16 : vector<1x1x1xi32> to vector<1x64x1xi32>
    %18 = arith.cmpi slt, %5, %17 : vector<1x64x1xi32>
    %19 = arith.andi %15, %18 : vector<1x64x1xi1>
    %20 = vector.broadcast %12 : vector<1x1x128xi1> to vector<1x64x128xi1>
    %21 = vector.broadcast %19 : vector<1x64x1xi1> to vector<1x64x128xi1>
    %22 = arith.ori %20, %21 : vector<1x64x128xi1>
    %cst = arith.constant 0.000000e+00 : f32
    %23 = vector.broadcast %cst : f32 to vector<1x64x128xf32>
    %24 = arith.select %22, %23, %0 : vector<1x64x128xi1>, vector<1x64x128xf32>
    %c0_14 = arith.constant 0 : index
    %c0_15 = arith.constant 0 : index
    %c0_16 = arith.constant 0 : index
    %25 = vector.load %arg7[%c0_14, %c0_15, %c0_16] : memref<1x64x128xf32, #tpu.memory_space<vmem>>, vector<1x64x128xf32>
    tpu.vector_store %arg7[%c0_14, %c0_15, %c0_16], %24 {strides = array<i32>} : memref<1x64x128xf32, #tpu.memory_space<vmem>>, vector<1x64x128xf32>,
    return
  }
  func.func @transform_0(%arg0: i32, %arg1: i32) -> (i32, i32, i32) {
    %c0_i32 = arith.constant 0 : i32
    %c0_i32_0 = arith.constant 0 : i32
    %c0_i32_1 = arith.constant 0 : i32
    return %arg0, %c0_i32, %c0_i32_0 : i32, i32, i32
  }
  func.func @transform_1(%arg0: i32, %arg1: i32) -> (i32, i32, i32) {
    %c0_i32 = arith.constant 0 : i32
    %c0_i32_0 = arith.constant 0 : i32
    %c0_i32_1 = arith.constant 0 : i32
    return %arg0, %c0_i32, %c0_i32_0 : i32, i32, i32
  }
  func.func @transform_2(%arg0: i32, %arg1: i32) -> (i32, i32, i32) {
    %c0_i32 = arith.constant 0 : i32
    %c0_i32_0 = arith.constant 0 : i32
    %c0_i32_1 = arith.constant 0 : i32
    return %arg0, %c0_i32, %c0_i32_0 : i32, i32, i32
  }
  func.func @transform_3(%arg0: i32, %arg1: i32) -> (i32, i32, i32) {
    %c0_i32 = arith.constant 0 : i32
    %c0_i32_0 = arith.constant 0 : i32
    %c0_i32_1 = arith.constant 0 : i32
    return %arg0, %c0_i32, %c0_i32_0 : i32, i32, i32
  }
  func.func @transform_4(%arg0: i32, %arg1: i32) -> (i32, i32, i32) {
    %c0_i32 = arith.constant 0 : i32
    %c0_i32_0 = arith.constant 0 : i32
    return %arg0, %c0_i32, %arg1 : i32, i32, i32
  }
  func.func @transform_5(%arg0: i32, %arg1: i32) -> (i32, i32, i32) {
    %c0_i32 = arith.constant 0 : i32
    %c0_i32_0 = arith.constant 0 : i32
    return %arg0, %c0_i32, %arg1 : i32, i32, i32
  }
}

</mosaic_0001>

<bundles_post_ra>
// kernel: tpu_custom_call.1
= control target key start
LH: loop header
LB: loop body
LE: loop exit
PB: predicated region body
PF: predicated region fallthrough
CT: control target
= control target key end

     0   :  { %10 = vsyncpa [#allocation3], 0  ;;  %s1080_s0 = inlined_call_operand.vmem [shape: s32[2,1,1], index: 0, kind: input, shape index: {}]   ;;  %s1081_s1 = inlined_call_operand.vmem [shape: s32[2,1,1], index: 1, kind: input, shape index: {}]   ;;  %s1082_s2 = inlined_call_operand.vmem [shape: s32[2,1,1], index: 2, kind: input, shape index: {}]   ;;  %s1083_s3 = inlined_call_operand.vmem [shape: s32[2,1,1], index: 3, kind: input, shape index: {}]   ;;  %s1084_s4 = inlined_call_operand.hbm [shape: f32[2,64,128], index: 4, kind: input, shape index: {}]   ;;  %s1085_s5 = inlined_call_operand.hbm [shape: f32[2,64,128], index: 5, kind: output, shape index: {}]  }
   0x1   :  { %12 = vsyncpa [#allocation3 + $0x1], 0 }
   0x2   :  { %13 = vsyncpa [#allocation4], 0 }
   0x3   :  { %15 = vsyncpa [#allocation4 + $0x1], 0  ;;  %s832_s18 = smov 0   ;;  %s834_s19 = smov 0  }
   0x4   :  { %s836_s20 = smov 0   ;;  %s838_s21 = smov 0  }
   0x5   :  { %s840_s22 = smov 0   ;;  %s842_s23 = smov 0  }
   0x6 LB: > { %s593_s24 = sadd.s32 4294967295, %s793_s23   ;;  %s594_s25 = sadd.s32 4294967294, %s793_s23   ;;  %s793_s23 = sphi %s842_s23, %s21_s23   ;;  %s789_s22 = sphi %s840_s22, %s1104_s22   ;;  %s785_s21 = sphi %s838_s21, %s1103_s21   ;;  %s781_s20 = sphi %s836_s20, %s1102_s20   ;;  %s777_s19 = sphi %s834_s19, %s1101_s19   ;;  %s773_s18 = sphi %s832_s18, %s1100_s18  }
   0x7   : > { %s33_s26 = sadd.s32 1, %s789_s22  ;;  %s146_s27 = sadd.s32 1, %s781_s20 }
   0x8   : > { %p35_p0 = scmp.ge.s32.totalorder %s33_s26, 2  ;;  %p153_p1 = scmp.ne.s32.totalorder %s781_s20, %s777_s19 }
   0x9   : > { %p154_p2 = scmp.eq.s32.totalorder %s793_s23, 0  ;;  %p159_p3 = scmp.ne.s32.totalorder %s777_s19, %s773_s18 }
   0xa   : > { %s1106_s26 = smov (%p35_p0, %s33_s26), 0  ;;  %p160_p5 = scmp.eq.s32.totalorder %s593_s24, 0 }
   0xb   : > { %p873_p4 = por %p154_p2, %p153_p1  ;;  %s141_s29 = ssub.s32 %s789_s22, %s1106_s26 }
   0xc   : > { %p185_p6 = scmp.eq.s32.totalorder %s593_s24, 1  ;;  %p144_p7 = scmp.eq.s32.totalorder %s141_s29, 0 }
   0xd   : > { %p879_p8 = por %p160_p5, %p159_p3  ;;  %p191_p10 = scmp.eq.s32.totalorder %s594_s25, 1 }
   0xe   : > { %p883_p9 = por %p185_p6, %p153_p1  ;;  %p624_p13 = scmp.lt.s32.totalorder %s793_s23, 2 }
   0xf   : > { %s888_s7 = scalar_select %p144_p7, %s781_s20, %s146_s27  }
  0x10   : > { %s1090_s6 = scalar_select %p883_p9, 1, 0 }
  0x11   : > { %p890_p11 = por %p191_p10, %p159_p3  ;;  %s235_s9 = sand.u32 1, %s781_s20  }
  0x12   : > { %s597_s10 = sshll.u32 %s235_s9, 6  ;;  %s610_s11 = sshll.u32 %s789_s22, 10 }
  0x13   : > { %s1091_s8 = scalar_select %p890_p11, 1, 0 }
  0x14   : > { %s901_s14 = scalar_lea.hbm %s1084_s4, %s610_s11  ;;  %s239_s15 = scalar_lea.vmem [#allocation2], %s597_s10 }
  0x15   : > { %s247_s16 = sshll.u32 %s239_s15, 4  ;;  %p907_p0 = pnand %p624_p13, %p873_p4  ;;  %s903_s16 = int_to_ptr.vmem [resolvable:$true] %s247_s16 }
  0x16   : > { %s912_s24 = scalar_lea.sflag [#allocation3], %s235_s9  ;;  %s681_s25 = scalar_lea.hbm %s901_s14, 1024 }
  0x17   : > { %p682_p2 = scmp.ne.s32.totalorder %s901_s14, %s681_s25  ;;  %p683_p3 = pneg %p907_p0 }
  0x18   : > { %s686_s28 = scalar_lea.hbm %s1084_s4, 2048  ;;  %p687_p4 = scmp.lt.u32.totalorder %s901_s14, %s1084_s4 }
  0x19   : > { %p684_p5 = pnand %p683_p3, %p682_p2  ;;  %p688_p7 = scmp.lt.u32.totalorder %s686_s28, %s681_s25 }
  0x1a   : > { %p690_p13 = scmp.lt.u32.totalorder %s681_s25, %s901_s14 }
  0x1b   : > { %p685_p6 = pneg %p684_p5  ;;  %p689_p10 = por %p688_p7, %p687_p4 }
  0x1d   : > { %p691_p12 = por %p690_p13, %p689_p10 }
  0x1f   : > { %p692_p1 = pnand %p691_p12, %p685_p6 }
  0x21   : > { %695 = shalt.err (!%p692_p1)
}
  0x22   : > { %s696_s9 = scalar_lea.vmem %s903_s16, 1024  ;;  %s795_s12 = smov [#allocation2]  }
  0x23   : > { %p697_p2 = scmp.ne.s32.totalorder %s903_s16, %s696_s9  ;;  %s701_s13 = sshll.u32 %s795_s12, 4  ;;  %s702_s13 = int_to_ptr.vmem [resolvable:$false] %s701_s13 }
  0x24   : > { %s703_s15 = scalar_lea.vmem %s702_s13, 2048  ;;  %p704_p9 = scmp.lt.s32.totalorder %s903_s16, %s702_s13 }
  0x25   : > { %p699_p5 = pnand %p697_p2, %p683_p3  ;;  %p705_p4 = scmp.lt.s32.totalorder %s703_s15, %s696_s9 }
  0x27   : > { %p700_p11 = pneg %p699_p5  ;;  %p706_p7 = por %p705_p4, %p704_p9 }
  0x29   : > { %p707_p10 = pnand %p706_p7, %p700_p11 }
  0x2b   : > { %710 = shalt.err (!%p707_p10)
}
  0x2c   : > { %s796_s25 = smov 128   ;;  %s797_s27 = smov 8  }
  0x2d   : > { %619 = dma.hbm_to_vmem [thread:$0]  (!%p907_p0), %s901_s14, 1024, %s903_s16, %s912_s24, %s796_s25, %s796_s25, %s797_s27  }
  0x2e   : > { %p255_p12 = scmp.lt.s32.totalorder %s793_s23, 3  ;;  %p1093_p1 = scmp.ge.s32.totalorder %s793_s23, 1 }
  0x30   : > { %p256_p3 = pnand %p1093_p1, %p255_p12 }
  0x31   : > { %s944_s29 = sand.u32 (!%p256_p3), 1, %s777_s19  }
  0x32   : > { %259 = sbr.rel (%p256_p3) target bundleno = 231 (0xe7), region = 40  ;;  %s1087_s28 = sshll.u32 (!%p256_p3), %s944_s29, 6 }
  0x33   : > { %s262_s10 = scalar_lea.sflag (!%p256_p3), [#allocation3], %s944_s29  ;;  %s950_s11 = scalar_lea.vmem (!%p256_p3), [#allocation2], %s1087_s28 }
  0x39   : > { %764 = dma.done.wait (%p879_p8), %s262_s10, 1024  }
  0x3a   : > { %766 = vsyncadd (%p879_p8), %s262_s10, 4294966272  ;;  %p304_p9 = scmp.lt.s32.totalorder %s785_s21, 1  ;;  %v325_v0 = vlaneseq  ;;  %v798_v1 = vmov 0   ;;  %v316_v29 = vld [vmem:[%s950_s11] sm:$0xff]  ;;  %v317_v32 = vld [vmem:[%s950_s11 + $0x8] sm:$0xff]  ;;  %s611_s16 = sshll.u32 %s785_s21, 10 }
  0x3b   : > { %679 = vset.pattern.permute.xlu0 %v798_v1  ;;  %680 = vset.pattern.permute.xlu1 %v798_v1  ;;  %v318_v34 = vld [vmem:[%s950_s11 + $0x10] sm:$0xff]  ;;  %v319_v38 = vld [vmem:[%s950_s11 + $0x18] sm:$0xff]  ;;  %v320_v41 = vld [vmem:[%s950_s11 + $0x20] sm:$0xff]  ;;  %s1026_s12 = scalar_lea.hbm %s1085_s5, %s611_s16  ;;  %p1097_p11 = scmp.ne.s32.totalorder %s1090_s6, 0 }
  0x3c   : > { %s305_s14 = scalar_select %p304_p9, %s785_s21, 1  ;;  %v959_v2 = vshrl.u32 %v325_v0, 7  ;;  %v326_v23 = vand.u32 127, %v325_v0  ;;  %v321_v45 = vld [vmem:[%s950_s11 + $0x28] sm:$0xff]  ;;  %v322_v47 = vld [vmem:[%s950_s11 + $0x30] sm:$0xff]  ;;  %v323_v51 = vld [vmem:[%s950_s11 + $0x38] sm:$0xff] }
  0x3d   : > { %s458_s21 = scalar_lea.sflag [#allocation4], %s944_s29  ;;  %s799_s11 = smov [#allocation5]  }
  0x3e   : > { %s306_s24 = scalar_lea.vmem %s1080_s0, %s305_s14  ;;  %s312_s30 = scalar_lea.vmem %s1082_s2, %s305_s14  ;;  %v331_v3 = vadd.s32 8, %v959_v2  ;;  %v332_v4 = vadd.s32 16, %v959_v2  ;;  %v333_v5 = vadd.s32 24, %v959_v2  ;;  %v334_v6 = vadd.s32 32, %v959_v2 }
  0x3f   : > { %s315_s25 = scalar_lea.vmem %s1083_s3, %s305_s14  ;;  %s309_s28 = scalar_lea.vmem %s1081_s1, %s305_s14  ;;  %v338_v7 = vld [vmem:[%s306_s24] sm:$0x1]  ;;  %v335_v12 = vadd.s32 40, %v959_v2  ;;  %v336_v13 = vadd.s32 48, %v959_v2  ;;  %v337_v16 = vadd.s32 56, %v959_v2  ;;  %v344_v22 = vsub.s32 0, %v959_v2 }
  0x40   : > { %v603_v8 = vld [vmem:[%s312_s30] ss:$0 sm:$0xff]  ;;  %340 = vperm.xlu0 %679, %v338_v7   ;;  %s715_s13 = sshll.u32 %s799_s11, 4  ;;  %s716_s13 = int_to_ptr.vmem [resolvable:$false] %s715_s13 }
  0x41   : > { %v604_v9 = vld [vmem:[%s315_s25] ss:$0 sm:$0xff]  ;;  %vm362_vm0 = vcmp.ge.s32.totalorder %v959_v2, %v603_v8  ;;  %vm363_vm2 = vcmp.ge.s32.totalorder %v331_v3, %v603_v8  ;;  %vm364_vm5 = vcmp.ge.s32.totalorder %v332_v4, %v603_v8  ;;  %vm365_vm8 = vcmp.ge.s32.totalorder %v333_v5, %v603_v8  ;;  %s717_s15 = scalar_lea.vmem %s716_s13, 2048 }
  0x42   : > { %vm375_vm1 = vcmp.lt.s32.totalorder %v959_v2, %v604_v9  ;;  %vm376_vm3 = vcmp.lt.s32.totalorder %v331_v3, %v604_v9  ;;  %v347_v10 = vld [vmem:[%s309_s28] sm:$0x1]  ;;  %vm377_vm6 = vcmp.lt.s32.totalorder %v332_v4, %v604_v9  ;;  %vm378_vm9 = vcmp.lt.s32.totalorder %v333_v5, %v604_v9  ;;  %s1096_s28 = sshll.u32 %s944_s29, 6 }
  0x43   : > { %vm383_vm4 = vmand %vm362_vm0, %vm375_vm1  ;;  %vm366_vm11 = vcmp.ge.s32.totalorder %v334_v6, %v603_v8  ;;  %vm379_vm12 = vcmp.lt.s32.totalorder %v334_v6, %v604_v9  ;;  %vm367_vm15 = vcmp.ge.s32.totalorder %v335_v12, %v603_v8  ;;  %vm380_vm0 = vcmp.lt.s32.totalorder %v335_v12, %v604_v9  ;;  %s997_s14 = scalar_lea.vmem [#allocation5], %s1096_s28 }
  0x44   : > { %v393_v11 = vsel %vm383_vm4, 1, %v798_v1  ;;  %vm384_vm7 = vmand %vm363_vm2, %vm376_vm3  ;;  %349 = vperm.xlu0 %679, %v347_v10   ;;  %vm368_vm1 = vcmp.ge.s32.totalorder %v336_v13, %v603_v8  ;;  %vm381_vm2 = vcmp.lt.s32.totalorder %v336_v13, %v604_v9  ;;  %s472_s17 = sshll.u32 %s997_s14, 4  ;;  %s1028_s17 = int_to_ptr.vmem [resolvable:$true] %s472_s17 }
  0x45   : > { %402 = vperm.xlu1 %680, %v393_v11   ;;  %vm385_vm10 = vmand %vm364_vm5, %vm377_vm6  ;;  %v394_v14 = vsel %vm384_vm7, 1, %v798_v1  ;;  %vm369_vm5 = vcmp.ge.s32.totalorder %v337_v16, %v603_v8  ;;  %vm382_vm6 = vcmp.lt.s32.totalorder %v337_v16, %v604_v9  ;;  %s711_s30 = scalar_lea.vmem %s1028_s17, 1024  ;;  %p718_p13 = scmp.lt.s32.totalorder %s1028_s17, %s716_s13 }
  0x46   : > { %v395_v15 = vsel %vm385_vm10, 1, %v798_v1  ;;  %vm386_vm13 = vmand %vm365_vm8, %vm378_vm9  ;;  %p712_p8 = scmp.ne.s32.totalorder %s1028_s17, %s711_s30  ;;  %p719_p2 = scmp.lt.s32.totalorder %s717_s15, %s711_s30 }
  0x47   : > { %vm387_vm14 = vmand %vm366_vm11, %vm379_vm12  ;;  %v396_v17 = vsel %vm386_vm13, 1, %v798_v1 }
  0x48   : > { %408 = vperm.xlu0 %679, %v395_v15   ;;  %v397_v18 = vsel %vm387_vm14, 1, %v798_v1  ;;  %vm388_vm3 = vmand %vm367_vm15, %vm380_vm0  ;;  %p713_p0 = pnand %p712_p8, %p1097_p11  ;;  %p720_p5 = por %p719_p2, %p718_p13 }
  0x49   : > { %405 = vperm.xlu1 %680, %v394_v14   ;;  %vm389_vm4 = vmand %vm368_vm1, %vm381_vm2  ;;  %v398_v19 = vsel %vm388_vm3, 1, %v798_v1 }
  0x4a   : > { %v399_v20 = vsel %vm389_vm4, 1, %v798_v1  ;;  %vm390_vm7 = vmand %vm369_vm5, %vm382_vm6  ;;  %p714_p6 = pneg %p713_p0 }
  0x4b   : > { %v400_v21 = vsel %vm390_vm7, 1, %v798_v1 }
  0x4c   : > { %414 = vperm.xlu0 %679, %v397_v18   ;;  %p721_p4 = pnand %p720_p5, %p714_p6 }
  0x4d   : > { %411 = vperm.xlu1 %680, %v396_v17  }
  0x50   : > { %420 = vperm.xlu0 %679, %v399_v20  }
  0x51   : > { %417 = vperm.xlu1 %680, %v398_v19  }
  0x55   : > { %423 = vperm.xlu1 %680, %v400_v21  }
  0xbf   : > { %v341_v24 = vpop.permute.xlu0 %340 }
  0xc0   : > { %v345_v25 = vrot.slane %v341_v24, %v344_v22 }
  0xc2   : > { %vm346_vm8 = vcmp.ge.s32.totalorder %v326_v23, %v345_v25 }
  0xc3   : > { %v350_v27 = vpop.permute.xlu0 %349 }
  0xc4   : > { %v403_v26 = vpop.permute.xlu1 %402  ;;  %v354_v28 = vrot.slane %v350_v27, %v344_v22 }
  0xc5   : > { %vm425_vm10 = vcmp.eq.s32.totalorder %v403_v26, 1 }
  0xc6   : > { %vm355_vm9 = vcmp.lt.s32.totalorder %v326_v23, %v354_v28 }
  0xc7   : > { %vm985_vm11 = vmand %vm346_vm8, %vm355_vm9  ;;  %v409_v33 = vpop.permute.xlu0 %408 }
  0xc8   : > { %v406_v30 = vpop.permute.xlu1 %405  ;;  %vm433_vm13 = vmor %vm985_vm11, %vm425_vm10  ;;  %vm427_vm14 = vcmp.eq.s32.totalorder %v409_v33, 1 }
  0xc9   : > { %vm426_vm12 = vcmp.eq.s32.totalorder %v406_v30, 1  ;;  %v441_v35 = vsel %vm433_vm13, 0.0, %v316_v29  ;;  %vm435_vm0 = vmor %vm985_vm11, %vm427_vm14 }
  0xca   : > { %vm434_vm15 = vmor %vm985_vm11, %vm426_vm12  ;;  %449 = vst [vmem:[%s997_s14] sm:$0xff] %v441_v35  ;;  %v443_v39 = vsel %vm435_vm0, 0.0, %v318_v34 }
  0xcb   : > { %v442_v36 = vsel %vm434_vm15, 0.0, %v317_v32  ;;  %v415_v40 = vpop.permute.xlu0 %414  ;;  %451 = vst [vmem:[%s997_s14 + $0x10] sm:$0xff] %v443_v39 }
  0xcc   : > { %v412_v37 = vpop.permute.xlu1 %411  ;;  %450 = vst [vmem:[%s997_s14 + $0x8] sm:$0xff] %v442_v36  ;;  %vm429_vm3 = vcmp.eq.s32.totalorder %v415_v40, 1 }
  0xcd   : > { %vm428_vm1 = vcmp.eq.s32.totalorder %v412_v37, 1  ;;  %vm437_vm4 = vmor %vm985_vm11, %vm429_vm3 }
  0xce   : > { %vm436_vm2 = vmor %vm985_vm11, %vm428_vm1  ;;  %v445_v43 = vsel %vm437_vm4, 0.0, %v320_v41 }
  0xcf   : > { %v444_v42 = vsel %vm436_vm2, 0.0, %v319_v38  ;;  %453 = vst [vmem:[%s997_s14 + $0x20] sm:$0xff] %v445_v43  ;;  %v421_v46 = vpop.permute.xlu0 %420 }
  0xd0   : > { %452 = vst [vmem:[%s997_s14 + $0x18] sm:$0xff] %v444_v42  ;;  %v418_v44 = vpop.permute.xlu1 %417  ;;  %vm431_vm7 = vcmp.eq.s32.totalorder %v421_v46, 1 }
  0xd1   : > { %vm430_vm5 = vcmp.eq.s32.totalorder %v418_v44, 1  ;;  %vm439_vm8 = vmor %vm985_vm11, %vm431_vm7 }
  0xd2   : > { %vm438_vm6 = vmor %vm985_vm11, %vm430_vm5  ;;  %v447_v49 = vsel %vm439_vm8, 0.0, %v322_v47 }
  0xd3   : > { %v446_v48 = vsel %vm438_vm6, 0.0, %v321_v45  ;;  %455 = vst [vmem:[%s997_s14 + $0x30] sm:$0xff] %v447_v49 }
  0xd4   : > { %454 = vst [vmem:[%s997_s14 + $0x28] sm:$0xff] %v446_v48  ;;  %v424_v50 = vpop.permute.xlu1 %423 }
  0xd5   : > { %vm432_vm9 = vcmp.eq.s32.totalorder %v424_v50, 1 }
  0xd6   : > { %vm440_vm10 = vmor %vm985_vm11, %vm432_vm9 }
  0xd7   : > { %v448_v52 = vsel %vm440_vm10, 0.0, %v323_v51 }
  0xd8   : > { %456 = vst [vmem:[%s997_s14 + $0x38] sm:$0xff] %v448_v52 }
  0xd9   : > { %724 = shalt.err (!%p721_p4)
}
  0xda   : > { %s725_s25 = scalar_lea.hbm %s1026_s12, 1024  ;;  %s729_s28 = scalar_lea.hbm %s1085_s5, 2048 }
  0xdb   : > { %p726_p7 = scmp.ne.s32.totalorder %s1026_s12, %s725_s25  ;;  %p730_p1 = scmp.lt.u32.totalorder %s1026_s12, %s1085_s5 }
  0xdc   : > { %p731_p3 = scmp.lt.u32.totalorder %s729_s28, %s725_s25  ;;  %p733_p8 = scmp.lt.u32.totalorder %s725_s25, %s1026_s12 }
  0xdd   : > { %p727_p10 = pnand %p726_p7, %p1097_p11 }
  0xde   : > { %p732_p9 = por %p731_p3, %p730_p1 }
  0xdf   : > { %p728_p12 = pneg %p727_p10 }
  0xe0   : > { %p734_p0 = por %p733_p8, %p732_p9 }
  0xe2   : > { %p735_p6 = pnand %p734_p0, %p728_p12 }
  0xe4   : > { %738 = shalt.err (!%p735_p6)
}
  0xe5   : > { %s800_s24 = smov 128   ;;  %s801_s9 = smov 8  }
  0xe6   : > { %614 = dma.vmem_to_hbm [thread:$0]  (%p1097_p11), %s1028_s17, 1024, %s1026_s12, %s458_s21, %s800_s24, %s800_s24, %s801_s9  }
  0xe7 PF: > { %s487_s30 = sand.u32 1, %s773_s18   ;;  %p1098_p13 = scmp.ne.s32.totalorder %s1091_s8, 0 }
  0xe8   : > { %p1099_p2 = scmp.ge.s32.totalorder %s793_s23, 2  ;;  %s488_s11 = scalar_lea.sflag [#allocation4], %s487_s30 }
  0xea   : > { %p621_p5 = pnand %p1099_p2, %p1098_p13 }
  0xec   : > { %768 = dma.done.wait (!%p621_p5), %s488_s11, 1024  }
  0xed   : > { %770 = vsyncadd (!%p621_p5), %s488_s11, 4294966272  ;;  %s21_s23 = sadd.s32 1, %s793_s23   ;;  %s1100_s18 = smov %s777_s19 }
  0xee   : > { %p18_p4 = scmp.ge.s32.totalorder %s21_s23, 4   ;;  %s1101_s19 = smov %s781_s20 }
  0xef   : > { %s1102_s20 = smov %s888_s7  ;;  %s1103_s21 = smov %s789_s22 }
  0xf0   : > { %s1104_s22 = smov %s1106_s26  ;;  %20 = sbr.rel (!%p18_p4) target bundleno = 6 (0x6), region = 97 }
  0xf7   :  { %493 = vsyncpa [#allocation3], 1 }
  0xf8   :  { %495 = vsyncpa [#allocation3 + $0x1], 1 }
  0xf9   :  { %496 = vsyncpa [#allocation4], 1 }
  0xfa   :  { %498 = vsyncpa [#allocation4 + $0x1], 1 }

</bundles_post_ra>
